<compile_context>
chip_gen: v7x
topology: tpu7x:2x2x1
jax: 0.10.0
libtpu: 0.0.40
codegen_flags: <defaults>
</compile_context>

<pallas_src>
import jax
import jax.numpy as jnp
from jax.experimental import pallas as pl
from jax.experimental.pallas import tpu as pltpu


def net_kernel(xt_ref, w1_ref, w2_ref, b2_ref, w3_ref, o_ref):
    xt = xt_ref[...]        # (2, tb)   feature-major: batch on the lane axis
    w1 = w1_ref[...]        # (10, 2)   PyTorch (out, in) layout

    # fc1 (K=2, no bias) on the VPU: two broadcast FMAs instead of paying an
    # MXU weight push/pop for a 2-wide contraction.
    h1 = w1[:, 0:1] * xt[0:1, :] + w1[:, 1:2] * xt[1:2, :]       # (10, tb)
    h1 = jnp.maximum(h1, 0.0)

    # fc2 (bias) + ReLU on the MXU: (50, 10) @ (10, tb) -> N = tb, lane-dense.
    h2 = jnp.dot(w2_ref[...], h1, preferred_element_type=jnp.float32)
    h2 = jnp.maximum(h2 + b2_ref[...], 0.0)                      # (50, tb)

    # fc3 (no bias) on the MXU: (4, 50) @ (50, tb).
    logits = jnp.dot(w3_ref[...], h2, preferred_element_type=jnp.float32)  # (4, tb)

    # Softmax over the 4 feature rows: pairwise VALU max/add on full 128-lane
    # vregs (no cross-lane XLU reduce), exact divide for proper normalization.
    m = jnp.maximum(jnp.maximum(logits[0:1, :], logits[1:2, :]),
                    jnp.maximum(logits[2:3, :], logits[3:4, :]))  # (1, tb)
    e = jnp.exp(logits - m)                                       # (4, tb)
    denom = (e[0:1, :] + e[1:2, :]) + (e[2:3, :] + e[3:4, :])     # (1, tb)
    o_ref[...] = (e / denom).astype(o_ref.dtype)


def prepare_params(params):
    """One-time layout prep (off the hot path). Weights stay in PyTorch
    (out, in) layout — the kernel computes W @ h directly. Bias is lifted to
    (50, 1) so it broadcasts over the lane (batch) axis."""
    return {
        "w1": jnp.asarray(params["fc1_w"], jnp.float32),                  # (10, 2)
        "w2": jnp.asarray(params["fc2_w"], jnp.float32),                  # (50, 10)
        "b2": jnp.asarray(params["fc2_b"], jnp.float32).reshape(-1, 1),   # (50, 1)
        "w3": jnp.asarray(params["fc3_w"], jnp.float32),                  # (4, 50)
    }


def _round_up(a, b):
    return ((a + b - 1) // b) * b


def net_forward(x, prepped, *, block_batch=4096):
    """x: (batch, 2) float32 -> (batch, 4) softmax probabilities."""
    w1, w2, b2, w3 = prepped["w1"], prepped["w2"], prepped["b2"], prepped["w3"]
    batch = x.shape[0]

    # --- static tile selection -------------------------------------------
    lane = 128
    padded = _round_up(batch, lane)
    units = padded // lane                      # number of 128-lane chunks
    max_units = max(1, block_batch // lane)
    if units >= 2:
        # At least 2 grid steps when possible (v7x megacore), capped tile size.
        per_tile = min(max_units, -(-units // 2))
    else:
        per_tile = 1
    tb = lane * per_tile
    padded = _round_up(padded, tb)
    n_tiles = padded // tb

    # --- layout glue: feature-major slab, only 8 B/row of padding ----------
    xt = jnp.pad(x.T, ((0, 0), (0, padded - batch)))      # (2, padded)

    flops = 2 * padded * (2 * 10 + 10 * 50 + 50 * 4)
    transcendentals = padded * 4                            # exp
    bytes_accessed = 4 * (2 * padded + 4 * padded + 10 * 2 + 50 * 10 + 50 + 4 * 50)

    out_fm = pl.pallas_call(
        net_kernel,
        out_shape=jax.ShapeDtypeStruct((4, padded), jnp.float32),
        grid=(n_tiles,),
        in_specs=[
            pl.BlockSpec((2, tb), lambda i: (0, i)),        # x: streamed, lane-dense
            pl.BlockSpec(w1.shape, lambda i: (0, 0)),       # weights/bias stay
            pl.BlockSpec(w2.shape, lambda i: (0, 0)),       # VMEM-resident
            pl.BlockSpec(b2.shape, lambda i: (0, 0)),
            pl.BlockSpec(w3.shape, lambda i: (0, 0)),
        ],
        out_specs=pl.BlockSpec((4, tb), lambda i: (0, i)),  # lane-dense stores
        compiler_params=pltpu.CompilerParams(
            dimension_semantics=("parallel",),
            vmem_limit_bytes=32 * 1024 * 1024,
        ),
        cost_estimate=pl.CostEstimate(
            flops=flops,
            transcendentals=transcendentals,
            bytes_accessed=bytes_accessed,
        ),
    )(xt, w1, w2, b2, w3)

    return out_fm[:, :batch].T                              # (batch, 4)


def init_params(key):
    """Deterministic init matching PyTorch Linear shapes (weight: (out, in))."""
    k1, k2, k3, k4 = jax.random.split(key, 4)

    def u(k, shape, fan_in):
        bound = 1.0 / jnp.sqrt(jnp.float32(fan_in))
        return jax.random.uniform(k, shape, jnp.float32, -bound, bound)

    return {
        "fc1_w": u(k1, (10, 2), 2),
        "fc2_w": u(k2, (50, 10), 10),
        "fc2_b": u(k3, (50,), 10),
        "fc3_w": u(k4, (4, 50), 50),
    }


def reference_forward(x, params):
    h1 = jnp.maximum(x @ params["fc1_w"].T, 0.0)
    h2 = jnp.maximum(h1 @ params["fc2_w"].T + params["fc2_b"], 0.0)
    logits = h2 @ params["fc3_w"].T
    return jax.nn.softmax(logits, axis=1)


if __name__ == "__main__":
    key = jax.random.PRNGKey(0)
    kx, kp = jax.random.split(key)

    # Small batch, not a multiple of 128 -> exercises the padding path.
    batch = 16
    x = jax.random.normal(kx, (batch, 2), jnp.float32)
    params = init_params(kp)
    prepped = prepare_params(params)    # layout prep done once, off hot path

    fwd = jax.jit(net_forward)
    out = jax.block_until_ready(fwd(x, prepped))

    ref = reference_forward(x, params)
    assert out.shape == (batch, 4)
    assert jnp.allclose(out, ref, atol=2e-3, rtol=2e-3), "mismatch vs reference"
    # Exact divide in the kernel -> rows sum to 1 to f32 rounding.
    assert jnp.allclose(jnp.sum(out, axis=1), 1.0, atol=1e-5), "softmax rows must sum to 1"

    print("KERNEL_OK")
</pallas_src>

<mosaic_0001>
module attributes {stable_mosaic.version = 11 : i64} {
  func.func @net_kernel(%arg0: i32, %arg1: memref<2x128xf32, #tpu.memory_space<vmem>>, %arg2: memref<10x2xf32, #tpu.memory_space<vmem>>, %arg3: memref<50x10xf32, #tpu.memory_space<vmem>>, %arg4: memref<50x1xf32, #tpu.memory_space<vmem>>, %arg5: memref<4x50xf32, #tpu.memory_space<vmem>>, %arg6: memref<4x128xf32, #tpu.memory_space<vmem>>) attributes {dimension_semantics = [#tpu.dimension_semantics<parallel>], iteration_bounds = array<i64: 1>, scalar_prefetch = 0 : i64, scratch_operands = 0 : i64, tpu.core_type = #tpu.core_type<tc>, window_params = [{transform_indices = @transform_0, window_bounds = array<i64: 2, 128>}, {pipeline_mode = #tpu.pipeline_mode<synchronous>, transform_indices = @transform_1, window_bounds = array<i64: 10, 2>}, {pipeline_mode = #tpu.pipeline_mode<synchronous>, transform_indices = @transform_2, window_bounds = array<i64: 50, 10>}, {pipeline_mode = #tpu.pipeline_mode<synchronous>, transform_indices = @transform_3, window_bounds = array<i64: 50, 1>}, {pipeline_mode = #tpu.pipeline_mode<synchronous>, transform_indices = @transform_4, window_bounds = array<i64: 4, 50>}, {transform_indices = @transform_5, window_bounds = array<i64: 4, 128>}]} {
    %c0 = arith.constant 0 : index
    %c0_0 = arith.constant 0 : index
    %0 = vector.load %arg1[%c0, %c0_0] : memref<2x128xf32, #tpu.memory_space<vmem>>, vector<2x128xf32>
    %c0_1 = arith.constant 0 : index
    %c0_2 = arith.constant 0 : index
    %1 = vector.load %arg2[%c0_1, %c0_2] : memref<10x2xf32, #tpu.memory_space<vmem>>, vector<10x2xf32>
    %2 = vector.extract_strided_slice %1 {offsets = [0, 0], sizes = [10, 1], strides = [1, 1]} : vector<10x2xf32> to vector<10x1xf32>
    %3 = vector.extract_strided_slice %0 {offsets = [0, 0], sizes = [1, 128], strides = [1, 1]} : vector<2x128xf32> to vector<1x128xf32>
    %4 = vector.broadcast %2 : vector<10x1xf32> to vector<10x128xf32>
    %5 = vector.broadcast %3 : vector<1x128xf32> to vector<10x128xf32>
    %6 = arith.mulf %4, %5 : vector<10x128xf32>
    %7 = vector.extract_strided_slice %1 {offsets = [0, 1], sizes = [10, 1], strides = [1, 1]} : vector<10x2xf32> to vector<10x1xf32>
    %8 = vector.extract_strided_slice %0 {offsets = [1, 0], sizes = [1, 128], strides = [1, 1]} : vector<2x128xf32> to vector<1x128xf32>
    %9 = vector.broadcast %7 : vector<10x1xf32> to vector<10x128xf32>
    %10 = vector.broadcast %8 : vector<1x128xf32> to vector<10x128xf32>
    %11 = arith.mulf %9, %10 : vector<10x128xf32>
    %12 = arith.addf %6, %11 : vector<10x128xf32>
    %cst = arith.constant 0.000000e+00 : f32
    %13 = vector.broadcast %cst : f32 to vector<10x128xf32>
    %14 = arith.maximumf %12, %13 : vector<10x128xf32>
    %c0_3 = arith.constant 0 : index
    %c0_4 = arith.constant 0 : index
    %15 = vector.load %arg3[%c0_3, %c0_4] : memref<50x10xf32, #tpu.memory_space<vmem>>, vector<50x10xf32>
    %cst_5 = arith.constant dense<0.000000e+00> : vector<50x128xf32>
    %16 = tpu.matmul %15, %14, %cst_5 {dimension_numbers = #tpu.dot_dimension_numbers<[1], [0], [0], [1], [0, 0, 1, 1], [], []>} : vector<50x10xf32>, vector<10x128xf32>, vector<50x128xf32> -> vector<50x128xf32>
    %c0_6 = arith.constant 0 : index
    %c0_7 = arith.constant 0 : index
    %17 = vector.load %arg4[%c0_6, %c0_7] : memref<50x1xf32, #tpu.memory_space<vmem>>, vector<50x1xf32>
    %18 = vector.broadcast %17 : vector<50x1xf32> to vector<50x128xf32>
    %19 = arith.addf %16, %18 : vector<50x128xf32>
    %cst_8 = arith.constant 0.000000e+00 : f32
    %20 = vector.broadcast %cst_8 : f32 to vector<50x128xf32>
    %21 = arith.maximumf %19, %20 : vector<50x128xf32>
    %c0_9 = arith.constant 0 : index
    %c0_10 = arith.constant 0 : index
    %22 = vector.load %arg5[%c0_9, %c0_10] : memref<4x50xf32, #tpu.memory_space<vmem>>, vector<4x50xf32>
    %cst_11 = arith.constant dense<0.000000e+00> : vector<4x128xf32>
    %23 = tpu.matmul %22, %21, %cst_11 {dimension_numbers = #tpu.dot_dimension_numbers<[1], [0], [0], [1], [0, 0, 1, 1], [], []>} : vector<4x50xf32>, vector<50x128xf32>, vector<4x128xf32> -> vector<4x128xf32>
    %24 = vector.extract_strided_slice %23 {offsets = [0, 0], sizes = [1, 128], strides = [1, 1]} : vector<4x128xf32> to vector<1x128xf32>
    %25 = vector.extract_strided_slice %23 {offsets = [1, 0], sizes = [1, 128], strides = [1, 1]} : vector<4x128xf32> to vector<1x128xf32>
    %26 = arith.maximumf %24, %25 : vector<1x128xf32>
    %27 = vector.extract_strided_slice %23 {offsets = [2, 0], sizes = [1, 128], strides = [1, 1]} : vector<4x128xf32> to vector<1x128xf32>
    %28 = vector.extract_strided_slice %23 {offsets = [3, 0], sizes = [1, 128], strides = [1, 1]} : vector<4x128xf32> to vector<1x128xf32>
    %29 = arith.maximumf %27, %28 : vector<1x128xf32>
    %30 = arith.maximumf %26, %29 : vector<1x128xf32>
    %31 = vector.broadcast %30 : vector<1x128xf32> to vector<4x128xf32>
    %32 = arith.subf %23, %31 : vector<4x128xf32>
    %33 = math.exp %32 : vector<4x128xf32>
    %34 = vector.extract_strided_slice %33 {offsets = [0, 0], sizes = [1, 128], strides = [1, 1]} : vector<4x128xf32> to vector<1x128xf32>
    %35 = vector.extract_strided_slice %33 {offsets = [1, 0], sizes = [1, 128], strides = [1, 1]} : vector<4x128xf32> to vector<1x128xf32>
    %36 = arith.addf %34, %35 : vector<1x128xf32>
    %37 = vector.extract_strided_slice %33 {offsets = [2, 0], sizes = [1, 128], strides = [1, 1]} : vector<4x128xf32> to vector<1x128xf32>
    %38 = vector.extract_strided_slice %33 {offsets = [3, 0], sizes = [1, 128], strides = [1, 1]} : vector<4x128xf32> to vector<1x128xf32>
    %39 = arith.addf %37, %38 : vector<1x128xf32>
    %40 = arith.addf %36, %39 : vector<1x128xf32>
    %41 = vector.broadcast %40 : vector<1x128xf32> to vector<4x128xf32>
    %42 = arith.divf %33, %41 : vector<4x128xf32>
    %c0_12 = arith.constant 0 : index
    %c0_13 = arith.constant 0 : index
    %43 = vector.load %arg6[%c0_12, %c0_13] : memref<4x128xf32, #tpu.memory_space<vmem>>, vector<4x128xf32>
    tpu.vector_store %arg6[%c0_12, %c0_13], %42 {strides = array<i32>} : memref<4x128xf32, #tpu.memory_space<vmem>>, vector<4x128xf32>,
    return
  }
  func.func @transform_0(%arg0: i32) -> (i32, i32) {
    %c0_i32 = arith.constant 0 : i32
    %c0_i32_0 = arith.constant 0 : i32
    return %c0_i32, %arg0 : i32, i32
  }
  func.func @transform_1(%arg0: i32) -> (i32, i32) {
    %c0_i32 = arith.constant 0 : i32
    %c0_i32_0 = arith.constant 0 : i32
    %c0_i32_1 = arith.constant 0 : i32
    return %c0_i32, %c0_i32_0 : i32, i32
  }
  func.func @transform_2(%arg0: i32) -> (i32, i32) {
    %c0_i32 = arith.constant 0 : i32
    %c0_i32_0 = arith.constant 0 : i32
    %c0_i32_1 = arith.constant 0 : i32
    return %c0_i32, %c0_i32_0 : i32, i32
  }
  func.func @transform_3(%arg0: i32) -> (i32, i32) {
    %c0_i32 = arith.constant 0 : i32
    %c0_i32_0 = arith.constant 0 : i32
    %c0_i32_1 = arith.constant 0 : i32
    return %c0_i32, %c0_i32_0 : i32, i32
  }
  func.func @transform_4(%arg0: i32) -> (i32, i32) {
    %c0_i32 = arith.constant 0 : i32
    %c0_i32_0 = arith.constant 0 : i32
    %c0_i32_1 = arith.constant 0 : i32
    return %c0_i32, %c0_i32_0 : i32, i32
  }
  func.func @transform_5(%arg0: i32) -> (i32, i32) {
    %c0_i32 = arith.constant 0 : i32
    %c0_i32_0 = arith.constant 0 : i32
    return %c0_i32, %arg0 : i32, i32
  }
}

</mosaic_0001>

<bundles_post_ra>
// kernel: net_forward.1
= control target key start
LH: loop header
LB: loop body
LE: loop exit
PB: predicated region body
PF: predicated region fallthrough
CT: control target
= control target key end

     0   :  { %v446_v0 = vmov 1   ;;  %v447_v1 = vmov 0   ;;  %v448_v6 = vmov 0.0|0.0   ;;  %vm449_vm0 = vmmov 0   ;;  %s574_s1 = inlined_call_operand.vmem [shape: f32[10,2], index: 1, kind: input, shape index: {}]   ;;  %s575_s3 = inlined_call_operand.vmem [shape: f32[50,1], index: 3, kind: input, shape index: {}]   ;;  %s576_s0 = inlined_call_operand.vmem [shape: f32[2,128], index: 0, kind: input, shape index: {}]   ;;  %s577_s2 = inlined_call_operand.vmem [shape: f32[50,10], index: 2, kind: input, shape index: {}]   ;;  %s578_s4 = inlined_call_operand.vmem [shape: f32[4,50], index: 4, kind: input, shape index: {}]   ;;  %s579_s5 = inlined_call_operand.vmem [shape: f32[4,128], index: 5, kind: output, shape index: {}]  }
   0x1   :  { %440 = vset.pattern.permute.xlu1 %v446_v0  ;;  %439 = vset.pattern.permute.xlu0 %v447_v1  ;;  %v21_v2 = vld [vmem:[%s574_s1] sm:$0xff]  ;;  %v22_v3 = vld [vmem:[%s574_s1 + $0x8] sm:$0x3]  ;;  %v66_v5 = vld [vmem:[%s575_s3 + $0x10] sm:$0xff]  ;;  %v450_v8 = vmov 0.0   ;;  %v33_v13 = vlaneseq  ;;  %vm128_vm1 = vcmask 1041408  }
   0x2   :  { %40 = vperm.xlu1 %440, %v21_v2   ;;  %25 = vperm.xlu0 %439, %v21_v2   ;;  %v64_v4 = vld [vmem:[%s575_s3] sm:$0xff]  ;;  %v70_v9 = vld [vmem:[%s575_s3 + $0x30] sm:$0x3]  ;;  %v65_v10 = vld [vmem:[%s575_s3 + $0x8] sm:$0xff]  ;;  %vm451_vm2 = vmmov 1   ;;  %vm106_vm4 = vcmask 80896  }
   0x3   :  { %420 = vmatprep.subr.bf16.mxu0 %v448_v6  ;;  %424 = vmatprep.subr.bf16.mxu1 %v448_v6  ;;  %v68_v7 = vld [vmem:[%s575_s3 + $0x20] sm:$0xff]  ;;  %v67_v11 = vld [vmem:[%s575_s3 + $0x18] sm:$0xff]  ;;  %v69_v12 = vld [vmem:[%s575_s3 + $0x28] sm:$0xff]  ;;  %v34_v14 = vshrl.u32 %v33_v13, 7  ;;  %vm240_vm5 = vcmask 408576  }
   0x4   :  { %382 = vmatprep.mubr.msk.f32.mxu0 %vm449_vm0, %v450_v8  ;;  %417 = vmatprep.mubr.msk.f32.mxu1 %vm449_vm0, %v450_v8  ;;  %v20_v17 = vld [vmem:[%s576_s0] sm:$0x3]  ;;  %vm422_vm3 = vmpackc.low %vm128_vm1, %vm451_vm2  ;;  %v58_v34 = vld [vmem:[%s577_s2 + $0x8] sm:$0xff] }
   0x5   :  { %v49_v15 = vsub.s32 1, %v34_v14  ;;  %v515_v16 = vsub.s32 0, %v34_v14  ;;  %v57_v33 = vld [vmem:[%s577_s2] sm:$0xff]  ;;  %v59_v35 = vld [vmem:[%s577_s2 + $0x10] sm:$0xff]  ;;  %v60_v36 = vld [vmem:[%s577_s2 + $0x18] sm:$0xff] }
   0x6   :  { %44 = vperm.xlu1 %440, %v22_v3   ;;  %30 = vperm.xlu0 %439, %v22_v3   ;;  %v61_v37 = vld [vmem:[%s577_s2 + $0x20] sm:$0xff]  ;;  %v62_v38 = vld [vmem:[%s577_s2 + $0x28] sm:$0xff]  ;;  %v63_v39 = vld [vmem:[%s577_s2 + $0x30] sm:$0x3] }
   0x7   :  { %v50_v18 = vrot.slane %v20_v17, %v49_v15  ;;  %v36_v19 = vrot.slane %v20_v17, %v515_v16  ;;  %v239_v17 = vld [vmem:[%s578_s4] sm:$0xf] }
   0xa   :  { %73 = vperm.xlu0 %439, %v64_v4   ;;  %441 = vset.pattern.permute.xlu1 %v447_v1 }
   0xb   :  { %78 = vperm.xlu1 %441, %v65_v10  }
   0xe   :  { %83 = vperm.xlu0 %439, %v66_v5  }
   0xf   :  { %88 = vperm.xlu1 %441, %v67_v11  }
  0x12   :  { %93 = vperm.xlu0 %439, %v68_v7  }
  0x13   :  { %98 = vperm.xlu1 %441, %v69_v12  }
  0x16   :  { %103 = vperm.xlu0 %439, %v70_v9  }
  0x81   :  { %v41_v20 = vpop.permute.xlu1 %40  ;;  %v26_v21 = vpop.permute.xlu0 %25 }
  0x82   :  { %v51_v22 = vmul.f32 %v50_v18, %v41_v20  ;;  %v37_v23 = vmul.f32 %v36_v19, %v26_v21 }
  0x84   :  { %v53_v26 = vadd.f32 %v51_v22, %v37_v23 }
  0x85   :  { %v45_v24 = vpop.permute.xlu1 %44  ;;  %v31_v25 = vpop.permute.xlu0 %30 }
  0x86   :  { %v52_v27 = vmul.f32 %v50_v18, %v45_v24  ;;  %v38_v28 = vmul.f32 %v36_v19, %v31_v25  ;;  %v55_v30 = vmax.f32 %v53_v26, 0.0 }
  0x88   :  { %v54_v29 = vadd.f32 %v52_v27, %v38_v28 }
  0x89   :  { %v74_v42 = vpop.permute.xlu0 %73 }
  0x8a   :  { %v56_v31 = vmax.f32 %v54_v29, 0.0  ;;  %v79_v43 = vpop.permute.xlu1 %78 }
  0x8c   :  { %v421_v32 = vpack.c.bf16 %v56_v31, %v55_v30 }
  0x8d   :  { %v84_v53 = vpop.permute.xlu0 %83 }
  0x8e   :  { %423 = vmatpush3.bf16.msk.msra.mxu0 %vm422_vm3, %v421_v32  ;;  %v89_v55 = vpop.permute.xlu1 %88 }
  0x91   :  { %383 = vmatmul.mubr.msk.f32.vlgmr.msra.gmra.mrb[0].mxu0 %vm106_vm4, %v57_v33  ;;  %v94_v0 = vpop.permute.xlu0 %93 }
  0x92   :  { %385 = vmatprep.mubr.msk.f32.mxu0 %vm449_vm0, %v450_v8  ;;  %v99_v2 = vpop.permute.xlu1 %98 }
  0x95   :  { %386 = vmatmul.mubr.msk.f32.gmra.mrb[2].mxu0 %vm106_vm4, %v58_v34  ;;  %v104_v10 = vpop.permute.xlu0 %103 }
  0x96   :  { %388 = vmatprep.mubr.msk.f32.mxu0 %vm449_vm0, %v450_v8 }
  0x99   :  { %389 = vmatmul.mubr.msk.f32.gmra.mrb[4].mxu0 %vm106_vm4, %v59_v35 }
  0x9a   :  { %391 = vmatprep.mubr.msk.f32.mxu0 %vm449_vm0, %v450_v8 }
  0x9d   :  { %392 = vmatmul.mubr.msk.f32.gmra.mrb[6].mxu0 %vm106_vm4, %v60_v36 }
  0x9e   :  { %394 = vmatprep.mubr.msk.f32.mxu0 %vm449_vm0, %v450_v8 }
  0xa1   :  { %395 = vmatmul.mubr.msk.f32.gmra.mrb[8].mxu0 %vm106_vm4, %v61_v37 }
  0xa2   :  { %397 = vmatprep.mubr.msk.f32.mxu0 %vm449_vm0, %v450_v8 }
  0xa5   :  { %398 = vmatmul.mubr.msk.f32.gmra.mrb[10].mxu0 %vm106_vm4, %v62_v38 }
  0xa6   :  { %400 = vmatprep.mubr.msk.f32.mxu0 %vm449_vm0, %v450_v8 }
  0xa9   :  { %401 = vmatmul.mubr.msk.f32.gmra.mrb[12].mxu0 %vm106_vm4, %v63_v39 }
 0x164   :  { %v198_v40 = vpop.f32.mrb[0].mxu0 }
 0x165   :  { %v384_v41 = vpop.f32.mrb[1].mxu0  ;;  %v199_v44 = vadd.f32 %v198_v40, %v74_v42 }
 0x167   :  { %v232_v48 = vmax.f32 %v199_v44, 0.0 }
 0x168   :  { %v203_v45 = vpop.f32.mrb[2].mxu0 }
 0x169   :  { %v204_v46 = vadd.f32 %v203_v45, %v79_v43  ;;  %v387_v47 = vpop.f32.mrb[3].mxu0 }
 0x16b   :  { %v233_v49 = vmax.f32 %v204_v46, 0.0 }
 0x16c   :  { %v208_v50 = vpop.f32.mrb[4].mxu0 }
 0x16d   :  { %v390_v51 = vpop.f32.mrb[5].mxu0  ;;  %v425_v52 = vpack.c.bf16 %v233_v49, %v232_v48  ;;  %v209_v54 = vadd.f32 %v208_v50, %v84_v53 }
 0x16f   :  { %426 = vmatpush3.bf16.msra.mxu1 %v425_v52  ;;  %v234_v59 = vmax.f32 %v209_v54, 0.0 }
 0x170   :  { %v213_v56 = vpop.f32.mrb[6].mxu0  ;;  %427 = vmatprep.subr.bf16.mxu1 %v448_v6 }
 0x171   :  { %v214_v57 = vadd.f32 %v213_v56, %v89_v55  ;;  %v393_v58 = vpop.f32.mrb[7].mxu0 }
 0x173   :  { %v235_v60 = vmax.f32 %v214_v57, 0.0 }
 0x174   :  { %v218_v61 = vpop.f32.mrb[8].mxu0 }
 0x175   :  { %v428_v62 = vpack.c.bf16 %v235_v60, %v234_v59  ;;  %v396_v63 = vpop.f32.mrb[9].mxu0  ;;  %v219_v1 = vadd.f32 %v218_v61, %v94_v0 }
 0x177   :  { %429 = vmatpush3.bf16.msra.mxu1 %v428_v62  ;;  %v236_v7 = vmax.f32 %v219_v1, 0.0 }
 0x178   :  { %v223_v3 = vpop.f32.mrb[10].mxu0  ;;  %430 = vmatprep.subr.bf16.mxu1 %v448_v6 }
 0x179   :  { %v224_v4 = vadd.f32 %v223_v3, %v99_v2  ;;  %v399_v5 = vpop.f32.mrb[11].mxu0 }
 0x17b   :  { %v237_v9 = vmax.f32 %v224_v4, 0.0 }
 0x17c   :  { %v228_v11 = vpop.f32.mrb[12].mxu0 }
 0x17d   :  { %v431_v12 = vpack.c.bf16 %v237_v9, %v236_v7  ;;  %v229_v13 = vadd.f32 %v228_v11, %v104_v10  ;;  %v402_v14 = vpop.f32.mrb[13].mxu0 }
 0x17f   :  { %432 = vmatpush3.bf16.msra.mxu1 %v431_v12  ;;  %v238_v15 = vmax.f32 %v229_v13, 0.0 }
 0x180   :  { %415 = vmatprep.subr.mxu1 %v450_v8 }
 0x183   :  { %416 = vmatpush3.msk.msra.mxu1 %vm128_vm1, %v238_v15 }
 0x184   :  { %418 = vmatmul.mubr.msk.f32.vlgmr.msra.gmra.mrb[0].mxu1 %vm240_vm5, %v239_v17 }
 0x257   :  { %v313_v6 = vpop.f32.mrb[0].mxu1 }
 0x258   :  { %v318_v18 = vrot.slane %v313_v6, 1  ;;  %v419_v19 = vpop.f32.mrb[1].mxu1 }
 0x25a   :  { %v320_v20 = vmax.f32 %v313_v6, %v318_v18 }
 0x25c   :  { %v322_v21 = vrot.slane %v320_v20, 2 }
 0x25e   :  { %v324_v22 = vmax.f32 %v320_v20, %v322_v21 }
 0x260   :  { %v328_v23 = vrot.slane %v324_v22, %v515_v16 }
 0x262   :  { %v329_v24 = vsub.f32 %v313_v6, %v328_v23 }
 0x264   :  { %v330_v25 = vmul.f32 1.442695, %v329_v24 }
 0x266   :  { %442 = vpow2.f32 %v330_v25 }
 0x270   :  { %v443_v8 = vpop.eup %442 }
 0x271   :  { %v333_v26 = vrot.slane %v443_v8, 1 }
 0x273   :  { %v335_v27 = vadd.f32 %v443_v8, %v333_v26 }
 0x275   :  { %v337_v28 = vrot.slane %v335_v27, 2 }
 0x277   :  { %v339_v29 = vadd.f32 %v337_v28, %v335_v27 }
 0x279   :  { %v343_v30 = vrot.slane %v339_v29, %v515_v16 }
 0x27b   :  { %444 = vrcp.f32 %v343_v30 }
 0x285   :  { %v445_v31 = vpop.eup %444 }
 0x286   :  { %v345_v32 = vmul.f32 %v445_v31, %v443_v8 }
 0x288   :  { %346 = vst [vmem:[%s579_s5] sm:$0xf] %v345_v32 }

</bundles_post_ra>
